<compile_context>
chip_gen: v5e
topology: v5e:2x2
jax: 0.10.0
libtpu: 0.0.40
codegen_flags: <defaults>
</compile_context>

<pallas_src>
import jax
import jax.numpy as jnp
from jax import lax
from jax.experimental import pallas as pl
from jax.experimental.pallas import tpu as pltpu

_EPS = 1e-5  # torch.nn.LayerNorm default


# ---------------------------------------------------------------------------
# VMEM budgeting (generation aware, honest about f32 temporaries + padding)
# ---------------------------------------------------------------------------

def _vmem_budget():
    """Return (total_live_budget_bytes, base_vmem_limit_bytes, capacity_bytes)."""
    cap = 64 * 1024 * 1024  # conservative default: assume v7x (64 MiB / TC)
    try:
        info = pltpu.get_tpu_info()
        cap = int(getattr(info, "vmem_capacity_bytes", cap)) or cap
    except Exception:
        pass
    if cap >= 128 * 1024 * 1024:          # v5e / v6e: 128 MiB physical VMEM
        return 80 * 1024 * 1024, 96 * 1024 * 1024, cap
    # v7x: 64 MiB physical VMEM per TensorCore -> keep plenty of headroom.
    return 40 * 1024 * 1024, 48 * 1024 * 1024, cap


def _live_bytes_per_elem(itemsize):
    # 2x input + 2x output pipeline buffers (itemsize each) plus ~2 block-sized
    # f32 temporaries inside the kernel (f32 upcast + fused output expression).
    return 4 * itemsize + 2 * 4


def _vmem_limit_for(est_live_bytes, base_limit, cap):
    limit = base_limit
    if est_live_bytes + (8 << 20) > limit:
        limit = min(est_live_bytes + (8 << 20), cap - (4 << 20))
    return int(max(limit, 16 << 20))


# ---------------------------------------------------------------------------
# Kernels (one-pass statistics, no `centered` temporary)
# ---------------------------------------------------------------------------

def _layernorm_sublane_kernel(x_ref, w_ref, b_ref, o_ref):
    """LayerNorm over the feature (sublane) axis of a (bc, F, t) block."""
    x = x_ref[...].astype(jnp.float32)                      # (bc, F, t)
    inv_f = 1.0 / x.shape[1]
    s1 = jnp.sum(x, axis=1, keepdims=True)                  # (bc, 1, t)
    s2 = jnp.sum(x * x, axis=1, keepdims=True)              # (bc, 1, t)
    mean = s1 * inv_f
    var = jnp.maximum(s2 * inv_f - mean * mean, 0.0)        # biased var (torch)
    inv = lax.rsqrt(var + _EPS)
    w = w_ref[...].astype(jnp.float32)                      # (1, F, 1)
    b = b_ref[...].astype(jnp.float32)                      # (1, F, 1)
    o_ref[...] = ((x - mean) * inv * w + b).astype(o_ref.dtype)


def _layernorm_lane_kernel(x_ref, w_ref, b_ref, o_ref):
    """Row-wise LayerNorm over the last (lane) axis of a (rows, F) block."""
    x = x_ref[...].astype(jnp.float32)                      # (rows, F)
    inv_f = 1.0 / x.shape[-1]
    s1 = jnp.sum(x, axis=-1, keepdims=True)
    s2 = jnp.sum(x * x, axis=-1, keepdims=True)
    mean = s1 * inv_f
    var = jnp.maximum(s2 * inv_f - mean * mean, 0.0)
    inv = lax.rsqrt(var + _EPS)
    w = w_ref[...].astype(jnp.float32)                      # (1, F)
    b = b_ref[...].astype(jnp.float32)                      # (1, F)
    o_ref[...] = ((x - mean) * inv * w + b).astype(o_ref.dtype)


# ---------------------------------------------------------------------------
# Tile selection
# ---------------------------------------------------------------------------

def _pick_tiles_main(bc, f, t, itemsize, live_budget):
    """Choose (bc_tile, num_bc, t_tile, num_t, est_live_bytes) for the main path."""
    bpe = _live_bytes_per_elem(itemsize)
    max_block_elems = max(1, live_budget // bpe)

    sub_mult = max(8, 32 // itemsize)            # f32: 8, bf16: 16, int8: 32
    f_pad = pl.cdiv(f, sub_mult) * sub_mult
    t_full_pad = pl.cdiv(t, 128) * 128

    if f_pad * t_full_pad <= max_block_elems:
        t_tile = t                                # whole time axis per block
    else:
        t_tile = max(128, (max_block_elems // f_pad) // 128 * 128)

    t_pad = pl.cdiv(t_tile, 128) * 128
    bc_tile = max(1, min(bc, max_block_elems // (f_pad * t_pad)))

    num_t = pl.cdiv(t, t_tile)
    num_bc = pl.cdiv(bc, bc_tile)
    total = num_bc * num_t

    # v7x has two TensorCores: keep >= 2 reasonably balanced grid blocks when
    # possible (no-op cost on single-TC v5e / v6e).
    if total == 1:
        if bc >= 2:
            bc_tile = pl.cdiv(bc, 2)
        elif t >= 256:
            t_tile = max(128, pl.cdiv(pl.cdiv(t, 2), 128) * 128)
    elif (total % 2 == 1) and total < 8 and (num_t % 2 == 1) and bc > num_bc:
        # Small odd grid: make num_bc even so both cores get equal work.
        bc_tile = max(1, pl.cdiv(bc, num_bc + 1))

    num_t = pl.cdiv(t, t_tile)
    num_bc = pl.cdiv(bc, bc_tile)
    t_pad = pl.cdiv(t_tile, 128) * 128
    est_live = bc_tile * f_pad * t_pad * bpe
    return bc_tile, num_bc, t_tile, num_t, est_live


def _pick_tiles_rows(rows, f, itemsize, live_budget):
    """Choose (row_tile, num_rows, est_live_bytes) for the short-T fallback."""
    bpe = _live_bytes_per_elem(itemsize)
    f_lane_pad = pl.cdiv(f, 128) * 128
    max_rows = max(8, (live_budget // (bpe * f_lane_pad)) // 8 * 8)

    row_tile = rows if rows <= max_rows else max_rows
    if pl.cdiv(rows, row_tile) == 1 and rows > 8:
        row_tile = pl.cdiv(pl.cdiv(rows, 2), 8) * 8   # >=2 blocks for v7x dual-TC
    num_rows = pl.cdiv(rows, row_tile)
    est_live = pl.cdiv(row_tile, 8) * 8 * f_lane_pad * bpe
    return row_tile, num_rows, est_live


# ---------------------------------------------------------------------------
# Public wrapper
# ---------------------------------------------------------------------------

def cnn_layer_norm(x, weight, bias):
    """Forward pass of CNNLayerNorm.

    x:      (batch, channel, feature, time)
    weight: (n_feats,)
    bias:   (n_feats,)
    returns (batch, channel, feature, time), same dtype as x.
    """
    B, C, F, T = x.shape
    itemsize = jnp.dtype(x.dtype).itemsize
    live_budget, base_limit, cap = _vmem_budget()

    if T >= 128:
        # ---- main path: native layout, time on lanes, feature on sublanes ---
        BC = B * C
        x3 = x.reshape(BC, F, T)                 # merging leading dims: free
        w3 = weight.reshape(1, F, 1)
        b3 = bias.reshape(1, F, 1)

        bc_tile, num_bc, t_tile, num_t, est_live = _pick_tiles_main(
            BC, F, T, itemsize, live_budget)
        vmem_limit = _vmem_limit_for(est_live, base_limit, cap)

        y3 = pl.pallas_call(
            _layernorm_sublane_kernel,
            out_shape=jax.ShapeDtypeStruct((BC, F, T), x.dtype),
            grid_spec=pltpu.PrefetchScalarGridSpec(
                num_scalar_prefetch=0,
                grid=(num_bc, num_t),
                in_specs=[
                    pl.BlockSpec((bc_tile, F, t_tile), lambda i, j: (i, 0, j)),
                    pl.BlockSpec((1, F, 1), lambda i, j: (0, 0, 0)),
                    pl.BlockSpec((1, F, 1), lambda i, j: (0, 0, 0)),
                ],
                out_specs=pl.BlockSpec((bc_tile, F, t_tile),
                                       lambda i, j: (i, 0, j)),
            ),
            compiler_params=pltpu.CompilerParams(
                dimension_semantics=("parallel", "parallel"),
                vmem_limit_bytes=vmem_limit,
            ),
        )(x3, w3, b3)
        return y3.reshape(B, C, F, T)

    # ---- short-time fallback (T < 128): lane-sparse time would make every
    # store a masked vst.msk, so present feature on lanes instead.
    rows = B * C * T
    x2 = jnp.transpose(x, (0, 1, 3, 2)).reshape(rows, F)
    w2 = weight.reshape(1, F)
    b2 = bias.reshape(1, F)

    row_tile, num_rows, est_live = _pick_tiles_rows(rows, F, itemsize, live_budget)
    vmem_limit = _vmem_limit_for(est_live, base_limit, cap)

    y2 = pl.pallas_call(
        _layernorm_lane_kernel,
        out_shape=jax.ShapeDtypeStruct((rows, F), x.dtype),
        grid_spec=pltpu.PrefetchScalarGridSpec(
            num_scalar_prefetch=0,
            grid=(num_rows,),
            in_specs=[
                pl.BlockSpec((row_tile, F), lambda i: (i, 0)),
                pl.BlockSpec((1, F), lambda i: (0, 0)),
                pl.BlockSpec((1, F), lambda i: (0, 0)),
            ],
            out_specs=pl.BlockSpec((row_tile, F), lambda i: (i, 0)),
        ),
        compiler_params=pltpu.CompilerParams(
            dimension_semantics=("parallel",),
            vmem_limit_bytes=vmem_limit,
        ),
    )(x2, w2, b2)
    return jnp.transpose(y2.reshape(B, C, T, F), (0, 1, 3, 2))


# ---------------------------------------------------------------------------
# Reference + self-test
# ---------------------------------------------------------------------------

def _reference(x, weight, bias):
    """Pure-JAX reference mirroring the PyTorch module (two-pass, f32)."""
    xt = jnp.transpose(x, (0, 1, 3, 2)).astype(jnp.float32)
    mean = jnp.mean(xt, axis=-1, keepdims=True)
    var = jnp.mean((xt - mean) ** 2, axis=-1, keepdims=True)
    y = (xt - mean) / jnp.sqrt(var + _EPS) * weight.astype(jnp.float32) \
        + bias.astype(jnp.float32)
    return jnp.transpose(y, (0, 1, 3, 2)).astype(x.dtype)


def _check(x, weight, bias, atol, rtol, name):
    out = jax.block_until_ready(cnn_layer_norm(x, weight, bias))
    ref = _reference(x, weight, bias)
    assert out.shape == x.shape and out.dtype == x.dtype, name
    out_f = out.astype(jnp.float32)
    ref_f = ref.astype(jnp.float32)
    err = jnp.max(jnp.abs(out_f - ref_f))
    assert jnp.allclose(out_f, ref_f, atol=atol, rtol=rtol), (
        f"{name}: max abs err = {err}")


if __name__ == "__main__":
    key = jax.random.PRNGKey(0)
    k1, k2, k3, kw, kb = jax.random.split(key, 5)

    n_feats = 16
    weight = 1.0 + 0.1 * jax.random.normal(kw, (n_feats,), dtype=jnp.float32)
    bias = 0.1 * jax.random.normal(kb, (n_feats,), dtype=jnp.float32)

    # 1) Small shapes from the module spec (short T -> lane-dense fallback path).
    x1 = jax.random.normal(k1, (2, 4, 16, 16), dtype=jnp.float32)
    _check(x1, weight, bias, 2e-5, 2e-5, "fallback/T=16/f32")

    # 2) Main path: T >= 128 not a multiple of 128, F not a multiple of 8,
    #    odd B*C -> multi-block grid with a partial bc block.
    f2 = 20
    w_f2 = 1.0 + 0.1 * jax.random.normal(kw, (f2,), dtype=jnp.float32)
    b_f2 = 0.1 * jax.random.normal(kb, (f2,), dtype=jnp.float32)
    x2 = jax.random.normal(k2, (1, 5, f2, 300), dtype=jnp.float32)
    _check(x2, w_f2, b_f2, 2e-5, 2e-5, "main/T=300/F=20/f32")

    # 3) Main path, bf16 input (exercises dtype-aware sublane padding).
    x3 = jax.random.normal(k3, (2, 2, 16, 256), dtype=jnp.bfloat16)
    _check(x3, weight, bias, 5e-2, 5e-2, "main/T=256/bf16")

    print("KERNEL_OK")
</pallas_src>

<mosaic_0001>
module attributes {stable_mosaic.version = 11 : i64} {
  func.func @_layernorm_lane_kernel(%arg0: i32, %arg1: memref<64x16xf32, #tpu.memory_space<vmem>>, %arg2: memref<1x16xf32, #tpu.memory_space<vmem>>, %arg3: memref<1x16xf32, #tpu.memory_space<vmem>>, %arg4: memref<64x16xf32, #tpu.memory_space<vmem>>) attributes {dimension_semantics = [#tpu.dimension_semantics<parallel>], iteration_bounds = array<i64: 2>, scalar_prefetch = 0 : i64, scratch_operands = 0 : i64, tpu.core_type = #tpu.core_type<tc>, window_params = [{transform_indices = @transform_0, window_bounds = array<i64: 64, 16>}, {pipeline_mode = #tpu.pipeline_mode<synchronous>, transform_indices = @transform_1, window_bounds = array<i64: 1, 16>}, {pipeline_mode = #tpu.pipeline_mode<synchronous>, transform_indices = @transform_2, window_bounds = array<i64: 1, 16>}, {transform_indices = @transform_3, window_bounds = array<i64: 64, 16>}]} {
    %c0 = arith.constant 0 : index
    %c0_0 = arith.constant 0 : index
    %0 = vector.load %arg1[%c0, %c0_0] : memref<64x16xf32, #tpu.memory_space<vmem>>, vector<64x16xf32>
    %cst = arith.constant dense<0.000000e+00> : vector<64xf32>
    %1 = vector.multi_reduction <add>, %0, %cst [1] : vector<64x16xf32> to vector<64xf32>
    %2 = vector.shape_cast %1 : vector<64xf32> to vector<64x1xf32>
    %3 = arith.mulf %0, %0 : vector<64x16xf32>
    %cst_1 = arith.constant dense<0.000000e+00> : vector<64xf32>
    %4 = vector.multi_reduction <add>, %3, %cst_1 [1] : vector<64x16xf32> to vector<64xf32>
    %5 = vector.shape_cast %4 : vector<64xf32> to vector<64x1xf32>
    %cst_2 = arith.constant 6.250000e-02 : f32
    %6 = vector.broadcast %cst_2 : f32 to vector<64x1xf32>
    %7 = arith.mulf %2, %6 : vector<64x1xf32>
    %cst_3 = arith.constant 6.250000e-02 : f32
    %8 = vector.broadcast %cst_3 : f32 to vector<64x1xf32>
    %9 = arith.mulf %5, %8 : vector<64x1xf32>
    %10 = arith.mulf %7, %7 : vector<64x1xf32>
    %11 = arith.subf %9, %10 : vector<64x1xf32>
    %cst_4 = arith.constant 0.000000e+00 : f32
    %12 = vector.broadcast %cst_4 : f32 to vector<64x1xf32>
    %13 = arith.maximumf %11, %12 : vector<64x1xf32>
    %cst_5 = arith.constant 9.99999974E-6 : f32
    %14 = vector.broadcast %cst_5 : f32 to vector<64x1xf32>
    %15 = arith.addf %13, %14 : vector<64x1xf32>
    %16 = math.rsqrt %15 : vector<64x1xf32>
    %c0_6 = arith.constant 0 : index
    %c0_7 = arith.constant 0 : index
    %17 = vector.load %arg2[%c0_6, %c0_7] : memref<1x16xf32, #tpu.memory_space<vmem>>, vector<1x16xf32>
    %c0_8 = arith.constant 0 : index
    %c0_9 = arith.constant 0 : index
    %18 = vector.load %arg3[%c0_8, %c0_9] : memref<1x16xf32, #tpu.memory_space<vmem>>, vector<1x16xf32>
    %19 = vector.broadcast %7 : vector<64x1xf32> to vector<64x16xf32>
    %20 = arith.subf %0, %19 : vector<64x16xf32>
    %21 = vector.broadcast %16 : vector<64x1xf32> to vector<64x16xf32>
    %22 = arith.mulf %20, %21 : vector<64x16xf32>
    %23 = vector.broadcast %17 : vector<1x16xf32> to vector<64x16xf32>
    %24 = arith.mulf %22, %23 : vector<64x16xf32>
    %25 = vector.broadcast %18 : vector<1x16xf32> to vector<64x16xf32>
    %26 = arith.addf %24, %25 : vector<64x16xf32>
    %c0_10 = arith.constant 0 : index
    %c0_11 = arith.constant 0 : index
    %27 = vector.load %arg4[%c0_10, %c0_11] : memref<64x16xf32, #tpu.memory_space<vmem>>, vector<64x16xf32>
    tpu.vector_store %arg4[%c0_10, %c0_11], %26 {strides = array<i32>} : memref<64x16xf32, #tpu.memory_space<vmem>>, vector<64x16xf32>,
    return
  }
  func.func @transform_0(%arg0: i32) -> (i32, i32) {
    %c0_i32 = arith.constant 0 : i32
    %c0_i32_0 = arith.constant 0 : i32
    return %arg0, %c0_i32 : i32, i32
  }
  func.func @transform_1(%arg0: i32) -> (i32, i32) {
    %c0_i32 = arith.constant 0 : i32
    %c0_i32_0 = arith.constant 0 : i32
    %c0_i32_1 = arith.constant 0 : i32
    return %c0_i32, %c0_i32_0 : i32, i32
  }
  func.func @transform_2(%arg0: i32) -> (i32, i32) {
    %c0_i32 = arith.constant 0 : i32
    %c0_i32_0 = arith.constant 0 : i32
    %c0_i32_1 = arith.constant 0 : i32
    return %c0_i32, %c0_i32_0 : i32, i32
  }
  func.func @transform_3(%arg0: i32) -> (i32, i32) {
    %c0_i32 = arith.constant 0 : i32
    %c0_i32_0 = arith.constant 0 : i32
    return %arg0, %c0_i32 : i32, i32
  }
}

</mosaic_0001>

<bundles_post_ra>
// kernel: tpu_custom_call.1
= control target key start
LH: loop header
LB: loop body
LE: loop exit
PB: predicated region body
PF: predicated region fallthrough
CT: control target
= control target key end

     0   :  { %s536_s12 = smov 0   ;;  %s765_s0 = inlined_call_operand.vmem [shape: f32[128,16], index: 0, kind: input, shape index: {}]   ;;  %s766_s1 = inlined_call_operand.vmem [shape: f32[1,16], index: 1, kind: input, shape index: {}]   ;;  %s767_s2 = inlined_call_operand.vmem [shape: f32[1,16], index: 2, kind: input, shape index: {}]   ;;  %s768_s3 = inlined_call_operand.vmem [shape: f32[128,16], index: 3, kind: output, shape index: {}]  }
   0x1 LB: > { %s471_s13 = sadd.s32 4294967295, %s514_s12   ;;  %p475_p0 = scmp.ge.s32.totalorder %s514_s12, 1  ;;  %s514_s12 = sphi %s536_s12, %s13_s12  }
   0x2   : > { %p138_p1 = scmp.lt.s32.totalorder %s514_s12, 3 }
   0x4   : > { %p139_p2 = pnand %p475_p0, %p138_p1 }
   0x5   : > { %s476_s14 = sshll.u32 (!%p139_p2), %s471_s13, 3 }
   0x6   : > { %142 = sbr.rel (%p139_p2) target bundleno = 207 (0xcf), region = 32  ;;  %p163_p3 = scmp.lt.s32.totalorder (!%p139_p2), %s476_s14, 15 }
   0xb   : > { %s770_s14 = smov (!%p163_p3, %s476_s14), 15  ;;  %vm182_vm0 = vcmask 130048  }
   0xc   : > { %s477_s15 = sshll.u32 %s770_s14, 3 }
   0xd   : > { %s166_s18 = scalar_lea.vmem %s765_s0, %s477_s15  ;;  %s694_s25 = scalar_lea.vmem %s768_s3, %s477_s15 }
   0xe   : > { %v552_v0 = vld [vmem:[%s166_s18 + $0x20] sm:$0xff]  ;;  %v554_v1 = vld [vmem:[%s166_s18 + $0x10] sm:$0xff]  ;;  %v564_v6 = vld [vmem:[%s166_s18 + $0x28] sm:$0xff] }
   0xf   : > { %v556_v2 = vld [vmem:[%s166_s18] sm:$0xff]  ;;  %v195_v3 = vsel %vm182_vm0, %v552_v0, 0.0  ;;  %v189_v4 = vsel %vm182_vm0, %v554_v1, 0.0  ;;  %v566_v7 = vld [vmem:[%s166_s18 + $0x18] sm:$0xff]  ;;  %v568_v8 = vld [vmem:[%s166_s18 + $0x8] sm:$0xff]  ;;  %v198_v9 = vsel %vm182_vm0, %v564_v6, 0.0  ;;  %v209_v18 = vmul.f32 %v554_v1, %v554_v1 }
  0x10   : > { %v183_v5 = vsel %vm182_vm0, %v556_v2, 0.0  ;;  %196 = vadd.xlane.f32.xlu2 %v195_v3  ;;  %190 = vadd.xlane.f32.xlu1 %v189_v4  ;;  %v192_v10 = vsel %vm182_vm0, %v566_v7, 0.0  ;;  %v186_v11 = vsel %vm182_vm0, %v568_v8, 0.0  ;;  %v207_v12 = vmul.f32 %v556_v2, %v556_v2  ;;  %v578_v13 = vld [vmem:[%s166_s18 + $0x38] sm:$0xff]  ;;  %v580_v14 = vld [vmem:[%s166_s18 + $0x30] sm:$0xff] }
  0x11   : > { %184 = vadd.xlane.f32.xlu0 %v183_v5  ;;  %v204_v15 = vsel %vm182_vm0, %v578_v13, 0.0  ;;  %v201_v17 = vsel %vm182_vm0, %v580_v14, 0.0  ;;  %v210_v19 = vmul.f32 %v566_v7, %v566_v7  ;;  %v208_v20 = vmul.f32 %v568_v8, %v568_v8 }
  0x12   : > { %v215_v16 = vsel %vm182_vm0, %v207_v12, 0.0  ;;  %v221_v21 = vsel %vm182_vm0, %v209_v18, 0.0  ;;  %v212_v24 = vmul.f32 %v564_v6, %v564_v6  ;;  %v213_v25 = vmul.f32 %v580_v14, %v580_v14 }
  0x13   : > { %v224_v22 = vsel %vm182_vm0, %v210_v19, 0.0  ;;  %v218_v23 = vsel %vm182_vm0, %v208_v20, 0.0  ;;  %v211_v26 = vmul.f32 %v552_v0, %v552_v0  ;;  %v214_v30 = vmul.f32 %v578_v13, %v578_v13 }
  0x14   : > { %v230_v27 = vsel %vm182_vm0, %v212_v24, 0.0  ;;  %v233_v28 = vsel %vm182_vm0, %v213_v25, 0.0 }
  0x15   : > { %v227_v29 = vsel %vm182_vm0, %v211_v26, 0.0  ;;  %v236_v31 = vsel %vm182_vm0, %v214_v30, 0.0 }
  0x18   : > { %199 = vadd.xlane.f32.xlu2 %v198_v9  ;;  %193 = vadd.xlane.f32.xlu1 %v192_v10 }
  0x19   : > { %187 = vadd.xlane.f32.xlu0 %v186_v11 }
  0x20   : > { %205 = vadd.xlane.f32.xlu1 %v204_v15  ;;  %216 = vadd.xlane.f32.xlu2 %v215_v16 }
  0x21   : > { %202 = vadd.xlane.f32.xlu0 %v201_v17 }
  0x28   : > { %222 = vadd.xlane.f32.xlu1 %v221_v21  ;;  %225 = vadd.xlane.f32.xlu2 %v224_v22 }
  0x29   : > { %219 = vadd.xlane.f32.xlu0 %v218_v23 }
  0x30   : > { %231 = vadd.xlane.f32.xlu1 %v230_v27  ;;  %234 = vadd.xlane.f32.xlu2 %v233_v28 }
  0x31   : > { %228 = vadd.xlane.f32.xlu0 %v227_v29 }
  0x39   : > { %237 = vadd.xlane.f32.xlu0 %v236_v31 }
  0x83   : > { %v197_v32 = vpop.xlane.xlu2 %196  ;;  %v191_v33 = vpop.xlane.xlu1 %190 }
  0x84   : > { %v185_v34 = vpop.xlane.xlu0 %184  ;;  %v614_v45 = vmul.f32 0.0625, %v191_v33  ;;  %v630_v10 = vmul.f32 0.0625, %v197_v32 }
  0x85   : > { %v608_v38 = vmul.f32 0.0625, %v185_v34 }
  0x86   : > { %v257_v50 = vmul.f32 %v614_v45, %v614_v45  ;;  %v259_v25 = vmul.f32 %v630_v10, %v630_v10 }
  0x87   : > { %v255_v41 = vmul.f32 %v608_v38, %v608_v38 }
  0x8b   : > { %v200_v35 = vpop.xlane.xlu2 %199  ;;  %v194_v36 = vpop.xlane.xlu1 %193 }
  0x8c   : > { %v188_v37 = vpop.xlane.xlu0 %187  ;;  %v616_v46 = vmul.f32 0.0625, %v194_v36  ;;  %v626_v62 = vmul.f32 0.0625, %v200_v35 }
  0x8d   : > { %v618_v48 = vmul.f32 0.0625, %v188_v37 }
  0x8e   : > { %v258_v53 = vmul.f32 %v616_v46, %v616_v46  ;;  %v260_v19 = vmul.f32 %v626_v62, %v626_v62 }
  0x8f   : > { %v256_v57 = vmul.f32 %v618_v48, %v618_v48 }
  0x93   : > { %v610_v39 = vpop.xlane.xlu1 %205  ;;  %v217_v40 = vpop.xlane.xlu2 %216 }
  0x94   : > { %v247_v42 = vmul.f32 0.0625, %v217_v40  ;;  %v203_v43 = vpop.xlane.xlu0 %202 }
  0x95   : > { %v628_v4 = vmul.f32 0.0625, %v203_v43 }
  0x96   : > { %v263_v44 = vsub.f32 %v247_v42, %v255_v41 }
  0x97   : > { %v261_v23 = vmul.f32 %v628_v4, %v628_v4 }
  0x98   : > { %v271_v47 = vmax.f32 %v263_v44, 0.0  ;;  %v369_v44 = vsub.f32 %v556_v2, %v608_v38 }
  0x9a   : > { %v279_v49 = vadd.f32 1e-05, %v271_v47  ;;  %v659_v47 = vmul.f32 0.0625, %v610_v39  ;;  %v372_v39 = vsub.f32 %v566_v7, %v616_v46 }
  0x9b   : > { %v223_v51 = vpop.xlane.xlu1 %222  ;;  %v226_v52 = vpop.xlane.xlu2 %225 }
  0x9c   : > { %492 = vrsqrt.f32 %v279_v49  ;;  %v249_v54 = vmul.f32 0.0625, %v223_v51  ;;  %v250_v55 = vmul.f32 0.0625, %v226_v52  ;;  %v220_v56 = vpop.xlane.xlu0 %219  ;;  %vm293_vm2 = vweird.f32 %v279_v49 }
  0x9d   : > { %v248_v58 = vmul.f32 0.0625, %v220_v56  ;;  %v371_v52 = vsub.f32 %v554_v1, %v614_v45 }
  0x9e   : > { %v265_v59 = vsub.f32 %v249_v54, %v257_v50  ;;  %v266_v60 = vsub.f32 %v250_v55, %v258_v53  ;;  %v678_v54 = vld [vmem:[%s767_s2] ss:$0 sm:$0xff] }
  0x9f   : > { %v264_v61 = vsub.f32 %v248_v58, %v256_v57 }
  0xa0   : > { %v273_v63 = vmax.f32 %v265_v59, 0.0  ;;  %v274_v3 = vmax.f32 %v266_v60, 0.0  ;;  %v262_v59 = vmul.f32 %v659_v47, %v659_v47 }
  0xa1   : > { %v272_v5 = vmax.f32 %v264_v61, 0.0 }
  0xa2   : > { %v493_v9 = vpop.eup %492  ;;  %v632_v11 = vadd.f32 1e-05, %v273_v63  ;;  %v634_v12 = vadd.f32 1e-05, %v274_v3 }
  0xa3   : > { %v288_v15 = vmul.f32 %v493_v9, %v279_v49  ;;  %v636_v16 = vadd.f32 1e-05, %v272_v5  ;;  %v232_v17 = vpop.xlane.xlu1 %231  ;;  %v235_v18 = vpop.xlane.xlu2 %234  ;;  %vm294_vm1 = vweird.f32 %v493_v9  ;;  %v664_v49 = vld [vmem:[%s766_s1] ss:$0 sm:$0xff] }
  0xa4   : > { %494 = vrsqrt.f32 %v632_v11  ;;  %v252_v20 = vmul.f32 0.0625, %v232_v17  ;;  %v229_v21 = vpop.xlane.xlu0 %228  ;;  %v253_v24 = vmul.f32 0.0625, %v235_v18  ;;  %vm295_vm3 = vmor %vm293_vm2, %vm294_vm1  ;;  %vm313_vm4 = vweird.f32 %v632_v11 }
  0xa5   : > { %v289_v22 = vmul.f32 %v493_v9, %v288_v15  ;;  %496 = vrsqrt.f32 %v634_v12  ;;  %v251_v27 = vmul.f32 0.0625, %v229_v21  ;;  %vm323_vm9 = vweird.f32 %v634_v12 }
  0xa6   : > { %498 = vrsqrt.f32 %v636_v16  ;;  %v268_v26 = vsub.f32 %v252_v20, %v260_v19  ;;  %v269_v29 = vsub.f32 %v253_v24, %v261_v23  ;;  %vm303_vm10 = vweird.f32 %v636_v16 }
  0xa7   : > { %v290_v28 = vmul.f32 0.5, %v289_v22  ;;  %v267_v31 = vsub.f32 %v251_v27, %v259_v25 }
  0xa8   : > { %v276_v30 = vmax.f32 %v268_v26, 0.0  ;;  %v277_v33 = vmax.f32 %v269_v29, 0.0  ;;  %v370_v26 = vsub.f32 %v568_v8, %v618_v48 }
  0xa9   : > { %v291_v32 = vsub.f32 1.5, %v290_v28  ;;  %v275_v42 = vmax.f32 %v267_v31, 0.0 }
  0xaa   : > { %v495_v34 = vpop.eup %494  ;;  %v647_v35 = vadd.f32 1e-05, %v276_v30  ;;  %v652_v41 = vadd.f32 1e-05, %v277_v33 }
  0xab   : > { %v649_v36 = vpop.eup %496  ;;  %v292_v37 = vmul.f32 %v493_v9, %v291_v32  ;;  %v308_v40 = vmul.f32 %v495_v34, %v632_v11  ;;  %v683_v57 = vadd.f32 1e-05, %v275_v42  ;;  %vm314_vm5 = vweird.f32 %v495_v34 }
  0xac   : > { %v654_v43 = vpop.eup %498  ;;  %v318_v50 = vmul.f32 %v649_v36, %v634_v12  ;;  %500 = vrsqrt.f32 %v647_v35  ;;  %v238_v51 = vpop.xlane.xlu0 %237  ;;  %vm324_vm6 = vweird.f32 %v649_v36  ;;  %vm315_vm8 = vmor %vm313_vm4, %vm314_vm5  ;;  %vm343_vm14 = vweird.f32 %v647_v35 }
  0xad   : > { %v296_v53 = vsel %vm295_vm3, %v493_v9, %v292_v37  ;;  %v309_v2 = vmul.f32 %v495_v34, %v308_v40  ;;  %v298_v38 = vmul.f32 %v654_v43, %v636_v16  ;;  %502 = vrsqrt.f32 %v652_v41  ;;  %vm325_vm11 = vmor %vm323_vm9, %vm324_vm6 }
  0xae   : > { %v377_v55 = vmul.f32 %v369_v44, %v296_v53  ;;  %v319_v56 = vmul.f32 %v649_v36, %v318_v50  ;;  %v254_v58 = vmul.f32 0.0625, %v238_v51  ;;  %504 = vrsqrt.f32 %v683_v57 }
  0xaf   : > { %v310_v1 = vmul.f32 0.5, %v309_v2  ;;  %v299_v45 = vmul.f32 %v654_v43, %v298_v38  ;;  %vm304_vm7 = vweird.f32 %v654_v43  ;;  %v374_v51 = vsub.f32 %v564_v6, %v626_v62 }
  0xb0   : > { %v388_v7 = vmul.f32 %v664_v49, %v377_v55  ;;  %v320_v46 = vmul.f32 0.5, %v319_v56  ;;  %v270_v9 = vsub.f32 %v254_v58, %v262_v59  ;;  %vm305_vm12 = vmor %vm303_vm10, %vm304_vm7  ;;  %vm353_vm2 = vweird.f32 %v652_v41 }
  0xb1   : > { %v311_v60 = vsub.f32 1.5, %v310_v1  ;;  %v300_v61 = vmul.f32 0.5, %v299_v45  ;;  %v375_v38 = vsub.f32 %v580_v14, %v628_v4  ;;  %vm333_vm5 = vweird.f32 %v683_v57 }
  0xb2   : > { %v501_v63 = vpop.eup %500  ;;  %v399_v3 = vadd.f32 %v678_v54, %v388_v7  ;;  %v321_v5 = vsub.f32 1.5, %v320_v46  ;;  %v278_v21 = vmax.f32 %v270_v9, 0.0  ;;  %v373_v14 = vsub.f32 %v552_v0, %v630_v10 }
  0xb3   : > { %v312_v15 = vmul.f32 %v495_v34, %v311_v60  ;;  %v301_v17 = vsub.f32 1.5, %v300_v61  ;;  %v338_v18 = vmul.f32 %v501_v63, %v647_v35  ;;  %v503_v19 = vpop.eup %502  ;;  %vm344_vm13 = vweird.f32 %v501_v63 }
  0xb4   : > { %407 = vst.msk [vmem:[%s694_s25] sm:$0xff] %vm182_vm0, %v399_v3  ;;  %v322_v20 = vmul.f32 %v649_v36, %v321_v5  ;;  %v348_v25 = vmul.f32 %v503_v19, %v652_v41  ;;  %v715_v12 = vadd.f32 1e-05, %v278_v21  ;;  %v505_v16 = vpop.eup %504  ;;  %vm354_vm15 = vweird.f32 %v503_v19  ;;  %vm345_vm1 = vmor %vm343_vm14, %vm344_vm13 }
  0xb5   : > { %v316_v22 = vsel %vm315_vm8, %v495_v34, %v312_v15  ;;  %v302_v23 = vmul.f32 %v654_v43, %v301_v17  ;;  %v339_v24 = vmul.f32 %v501_v63, %v338_v18  ;;  %v328_v8 = vmul.f32 %v505_v16, %v683_v57  ;;  %vm355_vm3 = vmor %vm353_vm2, %vm354_vm15 }
  0xb6   : > { %v379_v27 = vmul.f32 %v371_v52, %v316_v22  ;;  %v326_v11 = vsel %vm325_vm11, %v649_v36, %v322_v20  ;;  %v349_v31 = vmul.f32 %v503_v19, %v348_v25  ;;  %506 = vrsqrt.f32 %v715_v12 }
  0xb7   : > { %v380_v28 = vmul.f32 %v372_v39, %v326_v11  ;;  %v306_v29 = vsel %vm305_vm12, %v654_v43, %v302_v23  ;;  %v340_v30 = vmul.f32 0.5, %v339_v24  ;;  %v329_v42 = vmul.f32 %v505_v16, %v328_v8 }
  0xb8   : > { %v390_v32 = vmul.f32 %v664_v49, %v379_v27  ;;  %v378_v33 = vmul.f32 %v370_v26, %v306_v29  ;;  %v350_v36 = vmul.f32 0.5, %v349_v31  ;;  %vm334_vm4 = vweird.f32 %v505_v16 }
  0xb9   : > { %v391_v48 = vmul.f32 %v664_v49, %v380_v28  ;;  %v341_v34 = vsub.f32 1.5, %v340_v30  ;;  %v330_v53 = vmul.f32 0.5, %v329_v42  ;;  %vm335_vm6 = vmor %vm333_vm5, %vm334_vm4  ;;  %vm363_vm8 = vweird.f32 %v715_v12 }
  0xba   : > { %v401_v37 = vadd.f32 %v678_v54, %v390_v32  ;;  %v389_v40 = vmul.f32 %v664_v49, %v378_v33  ;;  %v351_v50 = vsub.f32 1.5, %v350_v36  ;;  %v376_v3 = vsub.f32 %v578_v13, %v659_v47 }
  0xbb   : > { %v402_v43 = vadd.f32 %v678_v54, %v391_v48  ;;  %v342_v44 = vmul.f32 %v501_v63, %v341_v34  ;;  %v331_v6 = vsub.f32 1.5, %v330_v53 }
  0xbc   : > { %409 = vst.msk [vmem:[%s694_s25 + $0x10] sm:$0xff] %vm182_vm0, %v401_v37  ;;  %v400_v52 = vadd.f32 %v678_v54, %v389_v40  ;;  %v352_v2 = vmul.f32 %v503_v19, %v351_v50  ;;  %v507_v62 = vpop.eup %506 }
  0xbd   : > { %410 = vst.msk [vmem:[%s694_s25 + $0x18] sm:$0xff] %vm182_vm0, %v402_v43  ;;  %v346_v35 = vsel %vm345_vm1, %v501_v63, %v342_v44  ;;  %v332_v45 = vmul.f32 %v505_v16, %v331_v6  ;;  %v358_v41 = vmul.f32 %v507_v62, %v715_v12  ;;  %vm364_vm7 = vweird.f32 %v507_v62 }
  0xbe   : > { %408 = vst.msk [vmem:[%s694_s25 + $0x8] sm:$0xff] %vm182_vm0, %v400_v52  ;;  %v382_v39 = vmul.f32 %v374_v51, %v346_v35  ;;  %v356_v55 = vsel %vm355_vm3, %v503_v19, %v352_v2  ;;  %vm365_vm9 = vmor %vm363_vm8, %vm364_vm7 }
  0xbf   : > { %v383_v1 = vmul.f32 %v375_v38, %v356_v55  ;;  %v336_v59 = vsel %vm335_vm6, %v505_v16, %v332_v45  ;;  %v359_v7 = vmul.f32 %v507_v62, %v358_v41 }
  0xc0   : > { %v393_v56 = vmul.f32 %v664_v49, %v382_v39  ;;  %v381_v46 = vmul.f32 %v373_v14, %v336_v59 }
  0xc1   : > { %v394_v58 = vmul.f32 %v664_v49, %v383_v1  ;;  %v360_v60 = vmul.f32 0.5, %v359_v7 }
  0xc2   : > { %v404_v4 = vadd.f32 %v678_v54, %v393_v56  ;;  %v392_v61 = vmul.f32 %v664_v49, %v381_v46 }
  0xc3   : > { %v405_v57 = vadd.f32 %v678_v54, %v394_v58  ;;  %v361_v0 = vsub.f32 1.5, %v360_v60 }
  0xc4   : > { %412 = vst.msk [vmem:[%s694_s25 + $0x28] sm:$0xff] %vm182_vm0, %v404_v4  ;;  %v403_v10 = vadd.f32 %v678_v54, %v392_v61 }
  0xc5   : > { %413 = vst.msk [vmem:[%s694_s25 + $0x30] sm:$0xff] %vm182_vm0, %v405_v57  ;;  %v362_v63 = vmul.f32 %v507_v62, %v361_v0 }
  0xc6   : > { %411 = vst.msk [vmem:[%s694_s25 + $0x20] sm:$0xff] %vm182_vm0, %v403_v10 }
  0xc7   : > { %v366_v5 = vsel %vm365_vm9, %v507_v62, %v362_v63 }
  0xc8   : > { %v384_v9 = vmul.f32 %v376_v3, %v366_v5 }
  0xca   : > { %v395_v15 = vmul.f32 %v664_v49, %v384_v9 }
  0xcc   : > { %v406_v17 = vadd.f32 %v678_v54, %v395_v15 }
  0xce   : > { %414 = vst.msk [vmem:[%s694_s25 + $0x38] sm:$0xff] %vm182_vm0, %v406_v17 }
  0xcf PF: > { %s13_s12 = sadd.s32 1, %s514_s12  }
  0xd0   : > { %p10_p4 = scmp.ge.s32.totalorder %s13_s12, 4  }
  0xd2   :  { %12 = sbr.rel (!%p10_p4) target bundleno = 1 (0x1), region = 62 }

</bundles_post_ra>
